<compile_context>
chip_gen: v7x
topology: tpu7x:2x2x1
jax: 0.10.0
libtpu: 0.0.40
codegen_flags: <defaults>
</compile_context>

<pallas_src>
import jax
import jax.numpy as jnp
import numpy as np
from jax.experimental import pallas as pl
from jax.experimental.pallas import tpu as pltpu

# ---------------- model dimensions ----------------
B, C, H, W = 2, 4, 16, 16          # input (NCHW)
IN_DIM = C * H * W                 # 1024
ENC_HID = 64                       # encoder hidden width (== 2*LATENT here)
LATENT = 32                        # latent_dims
REG_DIM = 16                       # regression_dims
BN_EPS = 1e-5

# bf16 weight-slab row offsets (all multiples of 16 -> bf16 sublane-tile aligned)
_W1_OFF = IN_DIM                   # fused [enc-L2(mu) . dis . reg-L1]      (64, 64)
_W2_OFF = IN_DIM + ENC_HID         # reg-L2 with BN1 folded in              (64, 64)
_W3_OFF = IN_DIM + 2 * ENC_HID     # reg-L3 with BN2 folded in (zero-padded to 64 cols)
_WSLAB_ROWS = IN_DIM + 3 * ENC_HID  # 1216


def disentangling_ae_kernel(x_ref, w_ref, b_ref, out_ref):
    """x_ref:   (B, IN_DIM)            bf16
       w_ref:   (_WSLAB_ROWS, ENC_HID) bf16   (ew1 + 3 fused weight blocks)
       b_ref:   (4, B, ENC_HID)        f32    (biases pre-broadcast over batch)
       out_ref: (B, ENC_HID)           f32    (columns >= REG_DIM are exactly zero)"""
    f32, bf16 = jnp.float32, jnp.bfloat16

    # encoder layer 1: bf16 x bf16 -> f32 accumulation on the MXU, bias, ReLU
    h = jnp.dot(x_ref[...], w_ref[0:IN_DIM, :], preferred_element_type=f32)
    h = jnp.maximum(h + b_ref[0], 0.0)

    # fused [encoder-L2(mu) -> deterministic latent -> disentangling -> reg-L1] + ReLU
    h1 = jnp.dot(h.astype(bf16), w_ref[_W1_OFF:_W1_OFF + ENC_HID, :],
                 preferred_element_type=f32)
    h1 = jnp.maximum(h1 + b_ref[1], 0.0)

    # regression-L2 with eval-mode BN1 folded in, + ReLU
    h2 = jnp.dot(h1.astype(bf16), w_ref[_W2_OFF:_W2_OFF + ENC_HID, :],
                 preferred_element_type=f32)
    h2 = jnp.maximum(h2 + b_ref[2], 0.0)

    # regression-L3 with eval-mode BN2 folded in; ReLU + Hardtanh(0,1) == clip(0,1)
    h3 = jnp.dot(h2.astype(bf16), w_ref[_W3_OFF:_W3_OFF + ENC_HID, :],
                 preferred_element_type=f32)
    out_ref[...] = jnp.clip(h3 + b_ref[3], 0.0, 1.0)


@jax.jit
def disentangling_ae_forward(x_nchw, wslab_bf16, biases_f32):
    """x_nchw: (B, C, H, W) f32 -> (B, REG_DIM) f32."""
    x2d = x_nchw.reshape(B, IN_DIM).astype(jnp.bfloat16)

    vmem = pl.BlockSpec(memory_space=pltpu.MemorySpace.VMEM)
    out = pl.pallas_call(
        disentangling_ae_kernel,
        out_shape=jax.ShapeDtypeStruct((B, ENC_HID), jnp.float32),
        in_specs=[vmem, vmem, vmem],
        out_specs=vmem,
    )(x2d, wslab_bf16, biases_f32)
    # lane slice done here (kernel stores its natural 64-lane width)
    return out[:, :REG_DIM]


# ---------------- host-side parameter folding & packing (done once) ----------------
def pack_params(p):
    """Fold mu-slice / disentangling / eval-mode BN into adjacent Linears, pack all
    weights into one bf16 slab and the 4 biases into a tiny pre-broadcast f32 block."""
    f32, bf16 = jnp.float32, jnp.bfloat16

    # (a) only the mu half of the encoder's second Linear is ever used
    ew2_mu = p["ew2"][:, :LATENT]                                   # (64, 32)
    eb2_mu = p["eb2"][:, :LATENT]                                   # (1, 32)

    # (b) enc-L2(mu) -> disentangling -> reg-L1: all affine, fold into one map
    w1f = ew2_mu @ p["dw"] @ p["rw1"]                               # (64, 64)
    b1f = (eb2_mu @ p["dw"] + p["db"]) @ p["rw1"] + p["rb1"]        # (1, 64)

    # (c) eval-mode BN is affine: y = a*scale + shift; fold into the following Linear
    def bn_scale_shift(bn):
        scale = bn[0] / jnp.sqrt(bn[3] + BN_EPS)                    # gamma * rsqrt(var+eps)
        shift = bn[1] - bn[2] * scale                               # beta - mean*scale
        return scale, shift

    s1, sh1 = bn_scale_shift(p["bn1"])
    w2f = s1[:, None] * p["rw2"]                                    # (64, 64)
    b2f = sh1[None, :] @ p["rw2"] + p["rb2"]                        # (1, 64)

    s2, sh2 = bn_scale_shift(p["bn2"])
    w3f = s2[:, None] * p["rw3"]                                    # (64, 16)
    b3f = sh2[None, :] @ p["rw3"] + p["rb3"]                        # (1, 16)

    # single bf16 weight slab: [ew1 ; w1f ; w2f ; w3f(zero-padded to 64 cols)]
    w3f_pad = jnp.zeros((ENC_HID, ENC_HID), f32).at[:, :REG_DIM].set(w3f)
    wslab_bf16 = jnp.concatenate([p["ew1"], w1f, w2f, w3f_pad], axis=0).astype(bf16)

    # f32 biases, zero-padded to 64 lanes and pre-broadcast over the batch rows
    b3f_pad = jnp.zeros((1, ENC_HID), f32).at[:, :REG_DIM].set(b3f)
    biases = jnp.concatenate([p["eb1"], b1f, b2f, b3f_pad], axis=0)        # (4, 64)
    biases_f32 = jnp.broadcast_to(biases[:, None, :], (4, B, ENC_HID)).astype(f32)

    return wslab_bf16, biases_f32


# ---------------- deterministic parameter init (PyTorch-layout equivalent) ----------------
def _init_params(key):
    ks = jax.random.split(key, 16)

    def lin(k, fan_in, fan_out):
        bound = 1.0 / np.sqrt(fan_in)
        kw, kb = jax.random.split(k)
        w = jax.random.uniform(kw, (fan_in, fan_out), jnp.float32, -bound, bound)
        b = jax.random.uniform(kb, (1, fan_out), jnp.float32, -bound, bound)
        return w, b

    ew1, eb1 = lin(ks[0], IN_DIM, ENC_HID)
    ew2, eb2 = lin(ks[1], ENC_HID, 2 * LATENT)
    dw, db = lin(ks[2], LATENT, LATENT)
    rw1, rb1 = lin(ks[3], LATENT, 2 * LATENT)
    rw2, rb2 = lin(ks[4], 2 * LATENT, 2 * LATENT)
    rw3, rb3 = lin(ks[5], 2 * LATENT, REG_DIM)

    def bn(k, n):
        kg, kb, km, kv = jax.random.split(k, 4)
        gamma = 1.0 + 0.1 * jax.random.normal(kg, (n,), jnp.float32)
        beta = 0.1 * jax.random.normal(kb, (n,), jnp.float32)
        mean = 0.1 * jax.random.normal(km, (n,), jnp.float32)
        var = jnp.abs(1.0 + 0.1 * jax.random.normal(kv, (n,), jnp.float32))
        return jnp.stack([gamma, beta, mean, var], axis=0)  # (4, n)

    bn1 = bn(ks[6], 2 * LATENT)
    bn2 = bn(ks[7], 2 * LATENT)

    return dict(ew1=ew1, eb1=eb1, ew2=ew2, eb2=eb2, dw=dw, db=db,
                rw1=rw1, rb1=rb1, bn1=bn1, rw2=rw2, rb2=rb2, bn2=bn2,
                rw3=rw3, rb3=rb3)


def _reference_forward(x_nchw, p):
    """Pure-JAX reference following the ORIGINAL (unfolded) module structure in f32,
    with the first Linear at the same bf16-weight precision the kernel uses."""
    f32 = jnp.float32
    x = x_nchw.reshape(B, IN_DIM)
    # encoder
    h = jnp.dot(x.astype(jnp.bfloat16), p["ew1"].astype(jnp.bfloat16),
                preferred_element_type=f32)
    h = jnp.maximum(h + p["eb1"], 0.0)
    z_params = h @ p["ew2"] + p["eb2"]
    # deterministic latent: z = mu
    z = z_params[:, :LATENT]
    # disentangling
    z = z @ p["dw"] + p["db"]

    def bn(a, b):
        return (a - b[2:3]) / jnp.sqrt(b[3:4] + BN_EPS) * b[0:1] + b[1:2]

    # regression model
    h1 = bn(jnp.maximum(z @ p["rw1"] + p["rb1"], 0.0), p["bn1"])
    h2 = bn(jnp.maximum(h1 @ p["rw2"] + p["rb2"], 0.0), p["bn2"])
    h3 = h2 @ p["rw3"] + p["rb3"]
    return jnp.clip(h3, 0.0, 1.0)          # ReLU + Hardtanh(0,1)


if __name__ == "__main__":
    key = jax.random.PRNGKey(0)
    k_x, k_p = jax.random.split(key)
    x = jax.random.normal(k_x, (B, C, H, W), jnp.float32)   # NCHW, as in PyTorch
    params = _init_params(k_p)
    wslab_bf16, biases_f32 = pack_params(params)

    out = disentangling_ae_forward(x, wslab_bf16, biases_f32)
    out = jax.block_until_ready(out)

    ref = _reference_forward(x, params)
    assert out.shape == (B, REG_DIM)
    # fused weights / dot-2..4 activations are bf16 in the kernel -> tolerance sized
    # for bf16 rounding against the f32 (layer-1 bf16) reference.
    np.testing.assert_allclose(np.asarray(out), np.asarray(ref), rtol=2e-2, atol=2e-2)

    print("KERNEL_OK")
</pallas_src>

<mosaic_0001>
module attributes {stable_mosaic.version = 11 : i64} {
  func.func @disentangling_ae_kernel(%arg0: memref<2x1024xbf16, #tpu.memory_space<vmem>>, %arg1: memref<1216x64xbf16, #tpu.memory_space<vmem>>, %arg2: memref<4x2x64xf32, #tpu.memory_space<vmem>>, %arg3: memref<2x64xf32, #tpu.memory_space<vmem>>) attributes {dimension_semantics = [], scalar_prefetch = 0 : i64, scratch_operands = 0 : i64, tpu.core_type = #tpu.core_type<tc>} {
    %c0 = arith.constant 0 : index
    %c0_0 = arith.constant 0 : index
    %0 = vector.load %arg0[%c0, %c0_0] : memref<2x1024xbf16, #tpu.memory_space<vmem>>, vector<2x1024xbf16>
    %c0_1 = arith.constant 0 : index
    %c0_2 = arith.constant 0 : index
    %1 = vector.load %arg1[%c0_1, %c0_2] : memref<1216x64xbf16, #tpu.memory_space<vmem>>, vector<1024x64xbf16>
    %cst = arith.constant dense<0.000000e+00> : vector<2x64xf32>
    %2 = tpu.matmul %0, %1, %cst {dimension_numbers = #tpu.dot_dimension_numbers<[1], [0], [0], [1], [0, 0, 1, 1], [], []>} : vector<2x1024xbf16>, vector<1024x64xbf16>, vector<2x64xf32> -> vector<2x64xf32>
    %c0_3 = arith.constant 0 : index
    %c0_4 = arith.constant 0 : index
    %c0_5 = arith.constant 0 : index
    %3 = vector.load %arg2[%c0_3, %c0_4, %c0_5] : memref<4x2x64xf32, #tpu.memory_space<vmem>>, vector<1x2x64xf32>
    %4 = vector.shape_cast %3 : vector<1x2x64xf32> to vector<2x64xf32>
    %5 = arith.addf %2, %4 : vector<2x64xf32>
    %cst_6 = arith.constant 0.000000e+00 : f32
    %6 = vector.broadcast %cst_6 : f32 to vector<2x64xf32>
    %7 = arith.maximumf %5, %6 : vector<2x64xf32>
    %8 = arith.truncf %7 : vector<2x64xf32> to vector<2x64xbf16>
    %c1024 = arith.constant 1024 : index
    %c0_7 = arith.constant 0 : index
    %9 = vector.load %arg1[%c1024, %c0_7] : memref<1216x64xbf16, #tpu.memory_space<vmem>>, vector<64x64xbf16>
    %cst_8 = arith.constant dense<0.000000e+00> : vector<2x64xf32>
    %10 = tpu.matmul %8, %9, %cst_8 {dimension_numbers = #tpu.dot_dimension_numbers<[1], [0], [0], [1], [0, 0, 1, 1], [], []>} : vector<2x64xbf16>, vector<64x64xbf16>, vector<2x64xf32> -> vector<2x64xf32>
    %c1 = arith.constant 1 : index
    %c0_9 = arith.constant 0 : index
    %c0_10 = arith.constant 0 : index
    %11 = vector.load %arg2[%c1, %c0_9, %c0_10] : memref<4x2x64xf32, #tpu.memory_space<vmem>>, vector<1x2x64xf32>
    %12 = vector.shape_cast %11 : vector<1x2x64xf32> to vector<2x64xf32>
    %13 = arith.addf %10, %12 : vector<2x64xf32>
    %cst_11 = arith.constant 0.000000e+00 : f32
    %14 = vector.broadcast %cst_11 : f32 to vector<2x64xf32>
    %15 = arith.maximumf %13, %14 : vector<2x64xf32>
    %16 = arith.truncf %15 : vector<2x64xf32> to vector<2x64xbf16>
    %c1088 = arith.constant 1088 : index
    %c0_12 = arith.constant 0 : index
    %17 = vector.load %arg1[%c1088, %c0_12] : memref<1216x64xbf16, #tpu.memory_space<vmem>>, vector<64x64xbf16>
    %cst_13 = arith.constant dense<0.000000e+00> : vector<2x64xf32>
    %18 = tpu.matmul %16, %17, %cst_13 {dimension_numbers = #tpu.dot_dimension_numbers<[1], [0], [0], [1], [0, 0, 1, 1], [], []>} : vector<2x64xbf16>, vector<64x64xbf16>, vector<2x64xf32> -> vector<2x64xf32>
    %c2 = arith.constant 2 : index
    %c0_14 = arith.constant 0 : index
    %c0_15 = arith.constant 0 : index
    %19 = vector.load %arg2[%c2, %c0_14, %c0_15] : memref<4x2x64xf32, #tpu.memory_space<vmem>>, vector<1x2x64xf32>
    %20 = vector.shape_cast %19 : vector<1x2x64xf32> to vector<2x64xf32>
    %21 = arith.addf %18, %20 : vector<2x64xf32>
    %cst_16 = arith.constant 0.000000e+00 : f32
    %22 = vector.broadcast %cst_16 : f32 to vector<2x64xf32>
    %23 = arith.maximumf %21, %22 : vector<2x64xf32>
    %24 = arith.truncf %23 : vector<2x64xf32> to vector<2x64xbf16>
    %c1152 = arith.constant 1152 : index
    %c0_17 = arith.constant 0 : index
    %25 = vector.load %arg1[%c1152, %c0_17] : memref<1216x64xbf16, #tpu.memory_space<vmem>>, vector<64x64xbf16>
    %cst_18 = arith.constant dense<0.000000e+00> : vector<2x64xf32>
    %26 = tpu.matmul %24, %25, %cst_18 {dimension_numbers = #tpu.dot_dimension_numbers<[1], [0], [0], [1], [0, 0, 1, 1], [], []>} : vector<2x64xbf16>, vector<64x64xbf16>, vector<2x64xf32> -> vector<2x64xf32>
    %c3 = arith.constant 3 : index
    %c0_19 = arith.constant 0 : index
    %c0_20 = arith.constant 0 : index
    %27 = vector.load %arg2[%c3, %c0_19, %c0_20] : memref<4x2x64xf32, #tpu.memory_space<vmem>>, vector<1x2x64xf32>
    %28 = vector.shape_cast %27 : vector<1x2x64xf32> to vector<2x64xf32>
    %29 = arith.addf %26, %28 : vector<2x64xf32>
    %cst_21 = arith.constant 0.000000e+00 : f32
    %cst_22 = arith.constant 1.000000e+00 : f32
    %30 = vector.broadcast %cst_21 : f32 to vector<2x64xf32>
    %31 = arith.maximumf %30, %29 : vector<2x64xf32>
    %32 = vector.broadcast %cst_22 : f32 to vector<2x64xf32>
    %33 = arith.minimumf %32, %31 : vector<2x64xf32>
    %c0_23 = arith.constant 0 : index
    %c0_24 = arith.constant 0 : index
    %34 = vector.load %arg3[%c0_23, %c0_24] : memref<2x64xf32, #tpu.memory_space<vmem>>, vector<2x64xf32>
    tpu.vector_store %arg3[%c0_23, %c0_24], %33 {strides = array<i32>} : memref<2x64xf32, #tpu.memory_space<vmem>>, vector<2x64xf32>,
    return
  }
}

</mosaic_0001>

<bundles_post_ra>
// kernel: disentangling_ae_forward.1
= control target key start
LH: loop header
LB: loop body
LE: loop exit
PB: predicated region body
PF: predicated region fallthrough
CT: control target
= control target key end

     0   :  { %v151_v28 = vlaneseq  ;;  %v1330_v36 = vmov 1966171168   ;;  %s1643_s0 = inlined_call_operand.vmem [shape: bf16[2,1024], index: 0, kind: input, shape index: {}]   ;;  %s1644_s1 = inlined_call_operand.vmem [shape: bf16[1216,64], index: 1, kind: input, shape index: {}]   ;;  %s1645_s2 = inlined_call_operand.vmem [shape: f32[4,2,64], index: 2, kind: input, shape index: {}]   ;;  %s1646_s3 = inlined_call_operand.hbm [shape: f32[2,64], index: 3, kind: output, shape index: {}]  }
   0x1   :  { %v1229_v0 = vld [vmem:[%s1644_s1 + $0x40] sm:$0xff]   ;;  %v1233_v4 = vld [vmem:[%s1644_s1 + $0x48] sm:$0xff]   ;;  %v1237_v8 = vld [vmem:[%s1644_s1 + $0x50] sm:$0xff]   ;;  %v149_v37 = vunpack.c.l.s4 %v1330_v36 }
   0x2   :  { %v1230_v1 = vld [vmem:[%s1644_s1 + $0xc0] sm:$0xff]   ;;  %1086 = vmatprep.subr.bf16.mxu0 %v1229_v0  ;;  %v1234_v5 = vld [vmem:[%s1644_s1 + $0xc8] sm:$0xff]   ;;  %v1238_v9 = vld [vmem:[%s1644_s1 + $0xd0] sm:$0xff]   ;;  %v152_v33 = vshrl.u32 %v151_v28, 7 }
   0x3   :  { %v1231_v2 = vld [vmem:[%s1644_s1] sm:$0xff]   ;;  %1108 = vmatprep.subr.bf16.mxu1 %v1230_v1  ;;  %v1235_v6 = vld [vmem:[%s1644_s1 + $0x8] sm:$0xff]   ;;  %v1239_v10 = vld [vmem:[%s1644_s1 + $0x10] sm:$0xff]   ;;  %v150_v40 = vunpack.c.0.s8 %v149_v37 }
   0x4   :  { %v1232_v3 = vld [vmem:[%s1644_s1 + $0x80] sm:$0xff]   ;;  %1087 = vmatpush3.bf16.msra.mxu0 %v1231_v2  ;;  %v1236_v7 = vld [vmem:[%s1644_s1 + $0x88] sm:$0xff]   ;;  %v1240_v11 = vld [vmem:[%s1644_s1 + $0x90] sm:$0xff]  }
   0x5   :  { %1109 = vmatpush3.bf16.msra.mxu1 %v1232_v3  ;;  %1088 = vmatprep.subr.bf16.mxu0 %v1233_v4  ;;  %v1241_v12 = vld [vmem:[%s1644_s1 + $0x58] sm:$0xff]   ;;  %v1245_v16 = vld [vmem:[%s1644_s1 + $0x60] sm:$0xff]   ;;  %v1249_v20 = vld [vmem:[%s1644_s1 + $0x68] sm:$0xff]   ;;  %v1459_v41 = vsub.s32 %v150_v40, %v152_v33 }
   0x6   :  { %1110 = vmatprep.subr.bf16.mxu1 %v1234_v5  ;;  %v1242_v13 = vld [vmem:[%s1644_s1 + $0xd8] sm:$0xff]   ;;  %v1246_v17 = vld [vmem:[%s1644_s1 + $0xe0] sm:$0xff]   ;;  %v1250_v21 = vld [vmem:[%s1644_s1 + $0xe8] sm:$0xff]  }
   0x7   :  { %v1243_v14 = vld [vmem:[%s1644_s1 + $0x18] sm:$0xff]   ;;  %v1247_v18 = vld [vmem:[%s1644_s1 + $0x20] sm:$0xff]   ;;  %v1251_v22 = vld [vmem:[%s1644_s1 + $0x28] sm:$0xff]  }
   0x8   :  { %1089 = vmatpush3.bf16.msra.mxu0 %v1235_v6  ;;  %v1244_v15 = vld [vmem:[%s1644_s1 + $0x98] sm:$0xff]   ;;  %v1248_v19 = vld [vmem:[%s1644_s1 + $0xa0] sm:$0xff]   ;;  %v1252_v23 = vld [vmem:[%s1644_s1 + $0xa8] sm:$0xff]  }
   0x9   :  { %1111 = vmatpush3.bf16.msra.mxu1 %v1236_v7  ;;  %1090 = vmatprep.subr.bf16.mxu0 %v1237_v8  ;;  %v1253_v24 = vld [vmem:[%s1644_s1 + $0x70] sm:$0xff]   ;;  %v1257_v29 = vld [vmem:[%s1644_s1 + $0x78] sm:$0xff]   ;;  %v16_v34 = vld [vmem:[%s1643_s0] sm:$0xff] }
   0xa   :  { %1112 = vmatprep.subr.bf16.mxu1 %v1238_v9  ;;  %v1254_v25 = vld [vmem:[%s1644_s1 + $0xf0] sm:$0xff]   ;;  %v1258_v30 = vld [vmem:[%s1644_s1 + $0xf8] sm:$0xff]   ;;  %v1262_v35 = vld [vmem:[%s1644_s1 + $0x140] sm:$0xff]   ;;  %v147_v39 = vcombine.high %v16_v34, %v16_v34  ;;  %v154_v42 = vrot.slane %v16_v34, %v1459_v41 }
   0xb   :  { %v1255_v26 = vld [vmem:[%s1644_s1 + $0x30] sm:$0xff]   ;;  %v1259_v31 = vld [vmem:[%s1644_s1 + $0x38] sm:$0xff]   ;;  %v1263_v38 = vld [vmem:[%s1644_s1 + $0x1c0] sm:$0xff]  }
   0xc   :  { %1091 = vmatpush3.bf16.msra.mxu0 %v1239_v10  ;;  %v1256_v27 = vld [vmem:[%s1644_s1 + $0xb0] sm:$0xff]   ;;  %v1260_v32 = vld [vmem:[%s1644_s1 + $0xb8] sm:$0xff]   ;;  %v1463_v43 = vrot.slane %v147_v39, %v1459_v41  ;;  %v162_v44 = vcombine.high %v154_v42, %v154_v42  ;;  %v170_v45 = vrot.slane %v154_v42, %v1459_v41  ;;  %v1264_v47 = vld [vmem:[%s1644_s1 + $0x100] sm:$0xff]  }
   0xd   :  { %1113 = vmatpush3.bf16.msra.mxu1 %v1240_v11  ;;  %1092 = vmatprep.subr.bf16.mxu0 %v1241_v12  ;;  %v1265_v49 = vld [vmem:[%s1644_s1 + $0x180] sm:$0xff]   ;;  %v1266_v52 = vld [vmem:[%s1644_s1 + $0x148] sm:$0xff]   ;;  %v1270_v58 = vld [vmem:[%s1644_s1 + $0x150] sm:$0xff]  }
   0xe   :  { %1114 = vmatprep.subr.bf16.mxu1 %v1242_v13  ;;  %v163_v46 = vcombine.high %v1463_v43, %v1463_v43  ;;  %v184_v48 = vrot.slane %v162_v44, %v1459_v41  ;;  %v192_v51 = vcombine.high %v170_v45, %v170_v45  ;;  %v1267_v54 = vld [vmem:[%s1644_s1 + $0x1c8] sm:$0xff]   ;;  %v1271_v59 = vld [vmem:[%s1644_s1 + $0x1d0] sm:$0xff]   ;;  %v1274_v62 = vld [vmem:[%s1644_s1 + $0x158] sm:$0xff]  }
   0xf   :  { %v1268_v55 = vld [vmem:[%s1644_s1 + $0x108] sm:$0xff]   ;;  %v1272_v60 = vld [vmem:[%s1644_s1 + $0x110] sm:$0xff]   ;;  %v1275_v63 = vld [vmem:[%s1644_s1 + $0x1d8] sm:$0xff]  }
  0x10   :  { %1093 = vmatpush3.bf16.msra.mxu0 %v1243_v14  ;;  %v191_v50 = vrot.slane %v163_v46, %v1459_v41  ;;  %620 = vmatprep.mubr.bf16.mxu0 %v184_v48  ;;  %v194_v53 = vcombine.high %v184_v48, %v184_v48  ;;  %v1269_v57 = vld [vmem:[%s1644_s1 + $0x188] sm:$0xff]   ;;  %v1273_v61 = vld [vmem:[%s1644_s1 + $0x190] sm:$0xff]   ;;  %v1276_v0 = vld [vmem:[%s1644_s1 + $0x118] sm:$0xff]  }
  0x11   :  { %1115 = vmatpush3.bf16.msra.mxu1 %v1244_v15  ;;  %1094 = vmatprep.subr.bf16.mxu0 %v1245_v16  ;;  %v1277_v1 = vld [vmem:[%s1644_s1 + $0x198] sm:$0xff]   ;;  %v1278_v2 = vld [vmem:[%s1644_s1 + $0x160] sm:$0xff]   ;;  %v1282_v6 = vld [vmem:[%s1644_s1 + $0x168] sm:$0xff]  }
  0x12   :  { %1116 = vmatprep.subr.bf16.mxu1 %v1246_v17  ;;  %v195_v56 = vcombine.high %v191_v50, %v191_v50  ;;  %660 = vmatprep.mubr.bf16.mxu1 %v194_v53  ;;  %v1279_v3 = vld [vmem:[%s1644_s1 + $0x1e0] sm:$0xff]   ;;  %v1283_v7 = vld [vmem:[%s1644_s1 + $0x1e8] sm:$0xff]   ;;  %v1286_v10 = vld [vmem:[%s1644_s1 + $0x170] sm:$0xff]   ;;  %v177_v17 = vrot.slane %v1463_v43, %v1459_v41 }
  0x13   :  { %v1280_v4 = vld [vmem:[%s1644_s1 + $0x120] sm:$0xff]   ;;  %v1284_v8 = vld [vmem:[%s1644_s1 + $0x128] sm:$0xff]   ;;  %v1287_v11 = vld [vmem:[%s1644_s1 + $0x1f0] sm:$0xff]  }
  0x14   :  { %1095 = vmatpush3.bf16.msra.mxu0 %v1247_v18  ;;  %v1281_v5 = vld [vmem:[%s1644_s1 + $0x1a0] sm:$0xff]   ;;  %v1285_v9 = vld [vmem:[%s1644_s1 + $0x1a8] sm:$0xff]   ;;  %v1288_v12 = vld [vmem:[%s1644_s1 + $0x130] sm:$0xff]  }
  0x15   :  { %1117 = vmatpush3.bf16.msra.mxu1 %v1248_v19  ;;  %1096 = vmatprep.subr.bf16.mxu0 %v1249_v20  ;;  %v1290_v13 = vld [vmem:[%s1644_s1 + $0x178] sm:$0xff]   ;;  %v1289_v14 = vld [vmem:[%s1644_s1 + $0x1b0] sm:$0xff]  }
  0x16   :  { %1118 = vmatprep.subr.bf16.mxu1 %v1250_v21  ;;  %v1291_v15 = vld [vmem:[%s1644_s1 + $0x1f8] sm:$0xff]  }
  0x17   :  { %v1292_v16 = vld [vmem:[%s1644_s1 + $0x138] sm:$0xff]  }
  0x18   :  { %1097 = vmatpush3.bf16.msra.mxu0 %v1251_v22 }
  0x19   :  { %1119 = vmatpush3.bf16.msra.mxu1 %v1252_v23  ;;  %1098 = vmatprep.subr.bf16.mxu0 %v1253_v24 }
  0x1a   :  { %1120 = vmatprep.subr.bf16.mxu1 %v1254_v25 }
  0x1c   :  { %1099 = vmatpush3.bf16.msra.mxu0 %v1255_v26 }
  0x1d   :  { %1121 = vmatpush3.bf16.msra.mxu1 %v1256_v27  ;;  %1100 = vmatprep.subr.bf16.mxu0 %v1257_v29 }
  0x1e   :  { %1122 = vmatprep.subr.bf16.mxu1 %v1258_v30 }
  0x20   :  { %1101 = vmatpush3.bf16.msra.mxu0 %v1259_v31 }
  0x21   :  { %1123 = vmatpush3.bf16.msra.mxu1 %v1260_v32  ;;  %1130 = vmatprep.subr.bf16.mxu0 %v1262_v35 }
  0x22   :  { %1152 = vmatprep.subr.bf16.mxu1 %v1263_v38 }
  0x23   :  { %621 = vmatmul.mubr.bf16.vlgmr.msra.gmra.mrb[0].mxu0 %v170_v45 }
  0x24   :  { %1131 = vmatpush3.bf16.msra.mxu0 %v1264_v47  ;;  %661 = vmatmul.mubr.bf16.vlgmr.msra.gmra.mrb[0].mxu1 %v192_v51 }
  0x25   :  { %1132 = vmatprep.subr.bf16.mxu0 %v1266_v52  ;;  %1153 = vmatpush3.bf16.msra.mxu1 %v1265_v49 }
  0x26   :  { %700 = vmatprep.mubr.bf16.mxu0 %v191_v50  ;;  %1154 = vmatprep.subr.bf16.mxu1 %v1267_v54 }
  0x27   :  { %740 = vmatprep.mubr.bf16.mxu1 %v195_v56 }
  0x28   :  { %1133 = vmatpush3.bf16.msra.mxu0 %v1268_v55 }
  0x29   :  { %1134 = vmatprep.subr.bf16.mxu0 %v1270_v58  ;;  %1155 = vmatpush3.bf16.msra.mxu1 %v1269_v57 }
  0x2a   :  { %1156 = vmatprep.subr.bf16.mxu1 %v1271_v59 }
  0x2c   :  { %1135 = vmatpush3.bf16.msra.mxu0 %v1272_v60 }
  0x2d   :  { %1136 = vmatprep.subr.bf16.mxu0 %v1274_v62  ;;  %1157 = vmatpush3.bf16.msra.mxu1 %v1273_v61 }
  0x2e   :  { %1158 = vmatprep.subr.bf16.mxu1 %v1275_v63 }
  0x30   :  { %1137 = vmatpush3.bf16.msra.mxu0 %v1276_v0 }
  0x31   :  { %1138 = vmatprep.subr.bf16.mxu0 %v1278_v2  ;;  %1159 = vmatpush3.bf16.msra.mxu1 %v1277_v1 }
  0x32   :  { %1160 = vmatprep.subr.bf16.mxu1 %v1279_v3 }
  0x34   :  { %1139 = vmatpush3.bf16.msra.mxu0 %v1280_v4 }
  0x35   :  { %1140 = vmatprep.subr.bf16.mxu0 %v1282_v6  ;;  %1161 = vmatpush3.bf16.msra.mxu1 %v1281_v5 }
  0x36   :  { %1162 = vmatprep.subr.bf16.mxu1 %v1283_v7 }
  0x38   :  { %1141 = vmatpush3.bf16.msra.mxu0 %v1284_v8 }
  0x39   :  { %1142 = vmatprep.subr.bf16.mxu0 %v1286_v10  ;;  %1163 = vmatpush3.bf16.msra.mxu1 %v1285_v9 }
  0x3a   :  { %1164 = vmatprep.subr.bf16.mxu1 %v1287_v11 }
  0x3c   :  { %1143 = vmatpush3.bf16.msra.mxu0 %v1288_v12 }
  0x3d   :  { %1144 = vmatprep.subr.bf16.mxu0 %v1290_v13 }
  0x3e   :  { %8 = vsyncpa [#allocation3], 0  ;;  %1165 = vmatpush3.bf16.msra.mxu1 %v1289_v14  ;;  %v1293_v18 = vld [vmem:[%s1644_s1 + $0x1b8] sm:$0xff]   ;;  %v193_v19 = vcombine.high %v177_v17, %v177_v17  ;;  %v1294_v20 = vld [vmem:[%s1644_s1 + $0x200] sm:$0xff]   ;;  %v1331_v21 = vmov 0.0   ;;  %vm1332_vm0 = vmmov 0  }
  0x3f   :  { %1166 = vmatprep.subr.bf16.mxu1 %v1291_v15  ;;  %v1295_v22 = vld [vmem:[%s1644_s1 + $0x208] sm:$0xff]   ;;  %v1296_v23 = vld [vmem:[%s1644_s1 + $0x210] sm:$0xff]   ;;  %v1297_v24 = vld [vmem:[%s1644_s1 + $0x218] sm:$0xff]   ;;  %vm784_vm1 = vcmask 523264   ;;  %vm988_vm2 = vcmask 517120  }
  0x40   :  { %1145 = vmatpush3.bf16.msra.mxu0 %v1292_v16  ;;  %v1298_v25 = vld [vmem:[%s1644_s1 + $0x220] sm:$0xff]   ;;  %v1299_v26 = vld [vmem:[%s1644_s1 + $0x228] sm:$0xff]   ;;  %v1300_v54 = vld [vmem:[%s1644_s1 + $0x230] sm:$0xff]  }
  0x41   :  { %1189 = vmatprep.subr.bf16.mxu0 %v1331_v21  ;;  %v145_v28 = vld [vmem:[%s1645_s2] sm:$0x3]  ;;  %v1301_v55 = vld [vmem:[%s1644_s1 + $0x238] sm:$0xff]   ;;  %v1303_v57 = vld [vmem:[%s1644_s1 + $0x248] sm:$0xff]  }
  0x42   :  { %1167 = vmatpush3.bf16.msra.mxu1 %v1293_v18  ;;  %v1302_v56 = vld [vmem:[%s1644_s1 + $0x240] sm:$0xff]   ;;  %v1304_v2 = vld [vmem:[%s1644_s1 + $0x250] sm:$0xff]   ;;  %v1305_v3 = vld [vmem:[%s1644_s1 + $0x258] sm:$0xff]   ;;  %s1333_s1 = smov [#allocation2]  }
  0x43   :  { %701 = vmatmul.mubr.bf16.vlgmr.msra.gmra.mrb[4].mxu0 %v177_v17  ;;  %1201 = vmatprep.subr.bf16.mxu1 %v1331_v21  ;;  %v1068_v58 = vld [vmem:[%s1645_s2 + $0x2] sm:$0x3]  ;;  %v1074_v4 = vld [vmem:[%s1645_s2 + $0x4] sm:$0x3]  ;;  %v1080_v12 = vld [vmem:[%s1645_s2 + $0x6] sm:$0x3] }
  0x44   :  { %1190 = vmatpush3.bf16.msra.mxu0 %v1294_v20  ;;  %1197 = vmatprep.mubr.msk.bf16.mxu0 %vm1332_vm0, %v1331_v21  ;;  %s996_s8 = sshll.u32 %s1333_s1, 4  ;;  %s997_s8 = int_to_ptr.vmem [resolvable:$true] %s996_s8 }
  0x45   :  { %741 = vmatmul.mubr.bf16.vlgmr.msra.gmra.mrb[4].mxu1 %v193_v19  ;;  %1191 = vmatprep.subr.bf16.mxu0 %v1331_v21  ;;  %s1306_s9 = scalar_lea.vmem %s997_s8, 32  ;;  %p1311_p1 = scmp.lt.s32.totalorder %s997_s8, %s997_s8 }
  0x46   :  { %1209 = vmatprep.mubr.msk.bf16.mxu1 %vm1332_vm0, %v1331_v21  ;;  %1202 = vmatpush3.bf16.msra.mxu1 %v1298_v25  ;;  %p1307_p0 = scmp.ne.s32.totalorder %s997_s8, %s1306_s9  ;;  %p1312_p2 = scmp.lt.s32.totalorder %s1306_s9, %s1306_s9 }
  0x47   :  { %1203 = vmatprep.subr.bf16.mxu1 %v1331_v21 }
  0x48   :  { %1192 = vmatpush3.bf16.msra.mxu0 %v1295_v22  ;;  %p1313_p3 = por %p1312_p2, %p1311_p1 }
  0x49   :  { %1193 = vmatprep.subr.bf16.mxu0 %v1331_v21 }
  0x4a   :  { %1204 = vmatpush3.bf16.msra.mxu1 %v1299_v26  ;;  %p1314_p4 = pnand %p1313_p3, %p1307_p0 }
  0x4b   :  { %1205 = vmatprep.subr.bf16.mxu1 %v1331_v21 }
  0x4c   :  { %1194 = vmatpush3.bf16.msra.mxu0 %v1296_v23 }
  0x4d   :  { %1195 = vmatprep.subr.bf16.mxu0 %v1331_v21 }
  0x4e   :  { %1206 = vmatpush3.bf16.msra.mxu1 %v1300_v54 }
  0x4f   :  { %1207 = vmatprep.subr.bf16.mxu1 %v1331_v21 }
  0x50   :  { %1196 = vmatpush3.bf16.msra.mxu0 %v1297_v24 }
  0x51   :  { %1213 = vmatprep.subr.bf16.mxu0 %v1331_v21 }
  0x52   :  { %1208 = vmatpush3.bf16.msra.mxu1 %v1301_v55 }
  0xf6   :  { %v1102_v27 = vpop.f32.mrb[0].mxu0 }
  0xf7   :  { %v1103_v29 = vpop.f32.mrb[1].mxu0  ;;  %v1124_v30 = vpop.f32.mrb[0].mxu1 }
  0xf8   :  { %v1104_v31 = vadd.f32 %v1103_v29, %v1102_v27  ;;  %v1105_v32 = vpop.f32.mrb[2].mxu0  ;;  %v1125_v33 = vpop.f32.mrb[1].mxu1 }
  0xf9   :  { %v1106_v34 = vpop.f32.mrb[3].mxu0  ;;  %v1126_v36 = vadd.f32 %v1125_v33, %v1124_v30  ;;  %v1127_v37 = vpop.f32.mrb[2].mxu1 }
  0xfa   :  { %v623_v35 = vadd.f32 %v1104_v31, %v145_v28  ;;  %v1128_v38 = vpop.f32.mrb[3].mxu1 }
  0xfc   :  { %v663_v39 = vadd.f32 %v1126_v36, %v623_v35 }
 0x116   :  { %v1146_v40 = vpop.f32.mrb[4].mxu0 }
 0x117   :  { %v1147_v41 = vpop.f32.mrb[5].mxu0 }
 0x118   :  { %v1168_v42 = vpop.f32.mrb[4].mxu1  ;;  %v1148_v43 = vadd.f32 %v1147_v41, %v1146_v40  ;;  %v1149_v44 = vpop.f32.mrb[6].mxu0 }
 0x119   :  { %v1169_v45 = vpop.f32.mrb[5].mxu1  ;;  %v1150_v46 = vpop.f32.mrb[7].mxu0 }
 0x11a   :  { %v703_v47 = vadd.f32 %v1148_v43, %v663_v39  ;;  %v1170_v48 = vadd.f32 %v1169_v45, %v1168_v42  ;;  %v1171_v49 = vpop.f32.mrb[6].mxu1 }
 0x11b   :  { %v1172_v50 = vpop.f32.mrb[7].mxu1 }
 0x11c   :  { %v743_v51 = vadd.f32 %v1170_v48, %v703_v47 }
 0x11e   :  { %v748_v52 = vmax.f32 %v743_v51, 0.0 }
 0x120   :  { %v749_v53 = vpack.c.bf16 %v748_v52, %v748_v52 }
 0x122   :  { %1198 = vmatmul.mubr.msk.bf16.vlgmr.msra.gmra.mrb[8].mxu0 %vm784_vm1, %v749_v53 }
 0x123   :  { %1221 = vmatprep.mubr.msk.bf16.mxu0 %vm1332_vm0, %v1331_v21  ;;  %1214 = vmatpush3.bf16.msra.mxu0 %v1302_v56 }
 0x124   :  { %1215 = vmatprep.subr.bf16.mxu0 %v1331_v21 }
 0x127   :  { %1216 = vmatpush3.bf16.msra.mxu0 %v1303_v57 }
 0x128   :  { %1217 = vmatprep.subr.bf16.mxu0 %v1331_v21 }
 0x12b   :  { %1218 = vmatpush3.bf16.msra.mxu0 %v1304_v2 }
 0x12c   :  { %1219 = vmatprep.subr.bf16.mxu0 %v1331_v21 }
 0x12f   :  { %1220 = vmatpush3.bf16.msra.mxu0 %v1305_v3 }
 0x1f5   :  { %v822_v59 = vpop.f32.mrb[8].mxu0 }
 0x1f6   :  { %v823_v60 = vadd.f32 %v1068_v58, %v822_v59  ;;  %v1199_v61 = vpop.f32.mrb[9].mxu0 }
 0x1f7   :  { %v825_v62 = vpop.f32.mrb[10].mxu0 }
 0x1f8   :  { %v828_v63 = vmax.f32 %v823_v60, 0.0  ;;  %v1200_v0 = vpop.f32.mrb[11].mxu0 }
 0x1fa   :  { %v829_v1 = vpack.c.bf16 %v828_v63, %v828_v63 }
 0x1fc   :  { %1210 = vmatmul.mubr.msk.bf16.vlgmr.msra.gmra.mrb[8].mxu1 %vm784_vm1, %v829_v1 }
 0x2cf   :  { %v901_v5 = vpop.f32.mrb[8].mxu1 }
 0x2d0   :  { %v902_v6 = vadd.f32 %v1074_v4, %v901_v5  ;;  %v1211_v7 = vpop.f32.mrb[9].mxu1 }
 0x2d1   :  { %v904_v8 = vpop.f32.mrb[10].mxu1 }
 0x2d2   :  { %v907_v9 = vmax.f32 %v902_v6, 0.0  ;;  %v1212_v10 = vpop.f32.mrb[11].mxu1 }
 0x2d4   :  { %v908_v11 = vpack.c.bf16 %v907_v9, %v907_v9 }
 0x2d6   :  { %1222 = vmatmul.mubr.msk.bf16.vlgmr.msra.gmra.mrb[12].mxu0 %vm784_vm1, %v908_v11 }
 0x3a9   :  { %v980_v13 = vpop.f32.mrb[12].mxu0 }
 0x3aa   :  { %v981_v14 = vadd.f32 %v1080_v12, %v980_v13  ;;  %v1223_v15 = vpop.f32.mrb[13].mxu0 }
 0x3ab   :  { %v983_v16 = vpop.f32.mrb[14].mxu0 }
 0x3ac   :  { %v986_v17 = vmax.f32 %v981_v14, 0.0  ;;  %v1224_v18 = vpop.f32.mrb[15].mxu0 }
 0x3ae   :  { %v987_v19 = vmin.f32 %v986_v17, 1.0 }
 0x3b0   :  { %989 = vst.msk [vmem:[#allocation2] sm:$0x3] %vm988_vm2, %v987_v19 }
 0x3b1   :  { %1317 = shalt.err (!%p1314_p4)
}
 0x3b2   :  { %s1318_s11 = scalar_lea.hbm %s1646_s3, 32 }
 0x3b3   :  { %p1319_p5 = scmp.ne.s32.totalorder %s1646_s3, %s1318_s11  ;;  %p1322_p6 = scmp.lt.u32.totalorder %s1318_s11, %s1646_s3 }
 0x3b5   :  { %p1324_p7 = pnand %p1322_p6, %p1319_p5 }
 0x3b7   :  { %1327 = shalt.err (!%p1324_p7)
}
 0x3b8   :  { %999 = dma.vmem_to_hbm [thread:$0]  %s997_s8, 32, %s1646_s3, [#allocation3]  }
 0x3b9   :  { %1328 = dma.done.wait [#allocation3], 32  }
 0x3ba   :  { %1329 = vsyncadd [#allocation3], 4294967264 }
 0x3bb   :  { %1003 = vsyncpa [#allocation3], 1 }

</bundles_post_ra>
